<compile_context>
chip_gen: v7x
topology: tpu7x:2x2x1
jax: 0.10.0
libtpu: 0.0.40
codegen_flags: <defaults>
</compile_context>

<pallas_src>
import jax
import jax.numpy as jnp
from jax.experimental import pallas as pl
from jax.experimental.pallas import tpu as pltpu


def _round_up(x, m):
    return ((x + m - 1) // m) * m


def simple_nn_kernel(x_ref, w1_ref, b1_ref, w2_ref, b2_ref, w3_ref, b3_ref,
                     o_ref):
    """Fused 3-layer MLP on one batch tile.

    f32 streamed input, bf16 MXU inputs, f32 accumulation, f32 bias-add/ReLU.
    """
    # Cast to bf16 in-kernel (free on the VPU in a mem-bound kernel).
    x = x_ref[...].astype(jnp.bfloat16)  # (TILE_B, in)

    # Layer 1: Linear(input_size -> hidden) + ReLU   (Dropout(0.2) = identity)
    h1 = jnp.dot(x, w1_ref[...], preferred_element_type=jnp.float32)
    h1 = jnp.maximum(h1 + b1_ref[...], 0.0)

    # Layer 2: Linear(hidden -> hidden//2) + ReLU    (Dropout(0.1) = identity)
    h2 = jnp.dot(h1.astype(jnp.bfloat16), w2_ref[...],
                 preferred_element_type=jnp.float32)
    h2 = jnp.maximum(h2 + b2_ref[...], 0.0)

    # Layer 3: Linear(hidden//2 -> output_size)      (narrow, real-width store)
    out = jnp.dot(h2.astype(jnp.bfloat16), w3_ref[...],
                  preferred_element_type=jnp.float32)
    o_ref[...] = out + b3_ref[...]


def _choose_tile_b(batch, max_tile_b):
    """Pick a batch tile: multiple of 16, large, >=2 grid steps when possible,
    and with minimal batch padding."""
    b16 = _round_up(max(batch, 1), 16)
    if b16 <= 16:
        return b16  # tiny batch: single 16-row tile
    # At least 2 steps (v7x has 2 TensorCores), more if batch exceeds the cap.
    n_steps = max(2, pl.cdiv(b16, max_tile_b))
    tile = _round_up(pl.cdiv(batch, n_steps), 16)
    return min(tile, max_tile_b)


def simple_nn_forward(x, params, max_tile_b=4096):
    """Batch-tiled, pipelined forward pass. Returns f32 [batch, output_size]."""
    w1, b1, w2, b2, w3, b3 = params
    batch, in_size = x.shape
    out_size = w3.shape[1]

    # bf16 weights for the MXU; biases stay f32 (tiny, resident in VMEM).
    w1_bf = w1.astype(jnp.bfloat16)
    w2_bf = w2.astype(jnp.bfloat16)
    w3_bf = w3.astype(jnp.bfloat16)

    # --- Batch tiling: large tiles, multiple of 16, minimal padding, and
    #     >= 2 grid steps when the batch allows (v7x two-TensorCore split). ---
    tile_b = _choose_tile_b(batch, max_tile_b)
    padded_b = _round_up(batch, tile_b)
    if padded_b != batch:
        x = jnp.pad(x, ((0, padded_b - batch), (0, 0)))
    grid = (padded_b // tile_b,)

    # Weights/biases: index_map always (0, 0) -> resident in VMEM for the
    # whole grid (no per-step re-DMA). x / out are tiled and double-buffered.
    out_padded = pl.pallas_call(
        simple_nn_kernel,
        out_shape=jax.ShapeDtypeStruct((padded_b, out_size), jnp.float32),
        grid=grid,
        in_specs=[
            pl.BlockSpec((tile_b, in_size), lambda i: (i, 0)),   # x (streamed)
            pl.BlockSpec(w1_bf.shape, lambda i: (0, 0)),         # w1 (resident)
            pl.BlockSpec(b1.shape, lambda i: (0, 0)),            # b1 (resident)
            pl.BlockSpec(w2_bf.shape, lambda i: (0, 0)),         # w2 (resident)
            pl.BlockSpec(b2.shape, lambda i: (0, 0)),            # b2 (resident)
            pl.BlockSpec(w3_bf.shape, lambda i: (0, 0)),         # w3 (resident)
            pl.BlockSpec(b3.shape, lambda i: (0, 0)),            # b3 (resident)
        ],
        out_specs=pl.BlockSpec((tile_b, out_size), lambda i: (i, 0)),
        compiler_params=pltpu.CompilerParams(
            dimension_semantics=("parallel",)),  # megacore split on v7x
    )(x, w1_bf, b1, w2_bf, b2, w3_bf, b3)

    # Slice off batch padding only (output lanes are already the real width).
    if padded_b != batch:
        return out_padded[:batch]
    return out_padded


def init_params(key, input_size=20, hidden_size=64, output_size=3):
    """Deterministic parameter init (uniform, Kaiming-style bound like nn.Linear)."""
    ks = jax.random.split(key, 6)

    def linear_init(kw, kb, fan_in, fan_out):
        bound = 1.0 / jnp.sqrt(fan_in)
        w = jax.random.uniform(kw, (fan_in, fan_out), jnp.float32, -bound, bound)
        b = jax.random.uniform(kb, (1, fan_out), jnp.float32, -bound, bound)
        return w, b

    w1, b1 = linear_init(ks[0], ks[1], input_size, hidden_size)
    w2, b2 = linear_init(ks[2], ks[3], hidden_size, hidden_size // 2)
    w3, b3 = linear_init(ks[4], ks[5], hidden_size // 2, output_size)
    return (w1, b1, w2, b2, w3, b3)


if __name__ == "__main__":
    key = jax.random.PRNGKey(0)
    k_params, k_x = jax.random.split(key)

    input_size, hidden_size, output_size = 20, 64, 3
    batch = 8

    params = init_params(k_params, input_size, hidden_size, output_size)
    x = jax.random.normal(k_x, (batch, input_size), jnp.float32)

    out = simple_nn_forward(x, params)
    jax.block_until_ready(out)

    # Reference check in plain JAX with the same bf16-input / f32-accumulate
    # math as the kernel.
    w1, b1, w2, b2, w3, b3 = params
    xb = x.astype(jnp.bfloat16)
    ref = jnp.maximum(
        jnp.dot(xb, w1.astype(jnp.bfloat16),
                preferred_element_type=jnp.float32) + b1, 0.0)
    ref = jnp.maximum(
        jnp.dot(ref.astype(jnp.bfloat16), w2.astype(jnp.bfloat16),
                preferred_element_type=jnp.float32) + b2, 0.0)
    ref = jnp.dot(ref.astype(jnp.bfloat16), w3.astype(jnp.bfloat16),
                  preferred_element_type=jnp.float32) + b3

    assert out.shape == (batch, output_size)
    assert jnp.allclose(out, ref, atol=1e-3, rtol=1e-3)

    # Sanity vs. full-f32 math (bf16 rounding tolerance).
    ref32 = jnp.maximum(x @ w1 + b1, 0.0)
    ref32 = jnp.maximum(ref32 @ w2 + b2, 0.0)
    ref32 = ref32 @ w3 + b3
    assert jnp.allclose(out, ref32, atol=5e-2, rtol=5e-2)

    print("KERNEL_OK")
</pallas_src>

<mosaic_0001>
module attributes {stable_mosaic.version = 11 : i64} {
  func.func @simple_nn_kernel(%arg0: i32, %arg1: memref<16x20xf32, #tpu.memory_space<vmem>>, %arg2: memref<20x64xbf16, #tpu.memory_space<vmem>>, %arg3: memref<1x64xf32, #tpu.memory_space<vmem>>, %arg4: memref<64x32xbf16, #tpu.memory_space<vmem>>, %arg5: memref<1x32xf32, #tpu.memory_space<vmem>>, %arg6: memref<32x3xbf16, #tpu.memory_space<vmem>>, %arg7: memref<1x3xf32, #tpu.memory_space<vmem>>, %arg8: memref<16x3xf32, #tpu.memory_space<vmem>>) attributes {dimension_semantics = [#tpu.dimension_semantics<parallel>], iteration_bounds = array<i64: 1>, scalar_prefetch = 0 : i64, scratch_operands = 0 : i64, tpu.core_type = #tpu.core_type<tc>, window_params = [{transform_indices = @transform_0, window_bounds = array<i64: 16, 20>}, {pipeline_mode = #tpu.pipeline_mode<synchronous>, transform_indices = @transform_1, window_bounds = array<i64: 20, 64>}, {pipeline_mode = #tpu.pipeline_mode<synchronous>, transform_indices = @transform_2, window_bounds = array<i64: 1, 64>}, {pipeline_mode = #tpu.pipeline_mode<synchronous>, transform_indices = @transform_3, window_bounds = array<i64: 64, 32>}, {pipeline_mode = #tpu.pipeline_mode<synchronous>, transform_indices = @transform_4, window_bounds = array<i64: 1, 32>}, {pipeline_mode = #tpu.pipeline_mode<synchronous>, transform_indices = @transform_5, window_bounds = array<i64: 32, 3>}, {pipeline_mode = #tpu.pipeline_mode<synchronous>, transform_indices = @transform_6, window_bounds = array<i64: 1, 3>}, {transform_indices = @transform_7, window_bounds = array<i64: 16, 3>}]} {
    %c0 = arith.constant 0 : index
    %c0_0 = arith.constant 0 : index
    %0 = vector.load %arg1[%c0, %c0_0] : memref<16x20xf32, #tpu.memory_space<vmem>>, vector<16x20xf32>
    %1 = arith.truncf %0 : vector<16x20xf32> to vector<16x20xbf16>
    %c0_1 = arith.constant 0 : index
    %c0_2 = arith.constant 0 : index
    %2 = vector.load %arg2[%c0_1, %c0_2] : memref<20x64xbf16, #tpu.memory_space<vmem>>, vector<20x64xbf16>
    %cst = arith.constant dense<0.000000e+00> : vector<16x64xf32>
    %3 = tpu.matmul %1, %2, %cst {dimension_numbers = #tpu.dot_dimension_numbers<[1], [0], [0], [1], [0, 0, 1, 1], [], []>} : vector<16x20xbf16>, vector<20x64xbf16>, vector<16x64xf32> -> vector<16x64xf32>
    %c0_3 = arith.constant 0 : index
    %c0_4 = arith.constant 0 : index
    %4 = vector.load %arg3[%c0_3, %c0_4] : memref<1x64xf32, #tpu.memory_space<vmem>>, vector<1x64xf32>
    %5 = vector.broadcast %4 : vector<1x64xf32> to vector<16x64xf32>
    %6 = arith.addf %3, %5 : vector<16x64xf32>
    %cst_5 = arith.constant 0.000000e+00 : f32
    %7 = vector.broadcast %cst_5 : f32 to vector<16x64xf32>
    %8 = arith.maximumf %6, %7 : vector<16x64xf32>
    %9 = arith.truncf %8 : vector<16x64xf32> to vector<16x64xbf16>
    %c0_6 = arith.constant 0 : index
    %c0_7 = arith.constant 0 : index
    %10 = vector.load %arg4[%c0_6, %c0_7] : memref<64x32xbf16, #tpu.memory_space<vmem>>, vector<64x32xbf16>
    %cst_8 = arith.constant dense<0.000000e+00> : vector<16x32xf32>
    %11 = tpu.matmul %9, %10, %cst_8 {dimension_numbers = #tpu.dot_dimension_numbers<[1], [0], [0], [1], [0, 0, 1, 1], [], []>} : vector<16x64xbf16>, vector<64x32xbf16>, vector<16x32xf32> -> vector<16x32xf32>
    %c0_9 = arith.constant 0 : index
    %c0_10 = arith.constant 0 : index
    %12 = vector.load %arg5[%c0_9, %c0_10] : memref<1x32xf32, #tpu.memory_space<vmem>>, vector<1x32xf32>
    %13 = vector.broadcast %12 : vector<1x32xf32> to vector<16x32xf32>
    %14 = arith.addf %11, %13 : vector<16x32xf32>
    %cst_11 = arith.constant 0.000000e+00 : f32
    %15 = vector.broadcast %cst_11 : f32 to vector<16x32xf32>
    %16 = arith.maximumf %14, %15 : vector<16x32xf32>
    %17 = arith.truncf %16 : vector<16x32xf32> to vector<16x32xbf16>
    %c0_12 = arith.constant 0 : index
    %c0_13 = arith.constant 0 : index
    %18 = vector.load %arg6[%c0_12, %c0_13] : memref<32x3xbf16, #tpu.memory_space<vmem>>, vector<32x3xbf16>
    %cst_14 = arith.constant dense<0.000000e+00> : vector<16x3xf32>
    %19 = tpu.matmul %17, %18, %cst_14 {dimension_numbers = #tpu.dot_dimension_numbers<[1], [0], [0], [1], [0, 0, 1, 1], [], []>} : vector<16x32xbf16>, vector<32x3xbf16>, vector<16x3xf32> -> vector<16x3xf32>
    %c0_15 = arith.constant 0 : index
    %c0_16 = arith.constant 0 : index
    %20 = vector.load %arg7[%c0_15, %c0_16] : memref<1x3xf32, #tpu.memory_space<vmem>>, vector<1x3xf32>
    %21 = vector.broadcast %20 : vector<1x3xf32> to vector<16x3xf32>
    %22 = arith.addf %19, %21 : vector<16x3xf32>
    %c0_17 = arith.constant 0 : index
    %c0_18 = arith.constant 0 : index
    %23 = vector.load %arg8[%c0_17, %c0_18] : memref<16x3xf32, #tpu.memory_space<vmem>>, vector<16x3xf32>
    tpu.vector_store %arg8[%c0_17, %c0_18], %22 {strides = array<i32>} : memref<16x3xf32, #tpu.memory_space<vmem>>, vector<16x3xf32>,
    return
  }
  func.func @transform_0(%arg0: i32) -> (i32, i32) {
    %c0_i32 = arith.constant 0 : i32
    %c0_i32_0 = arith.constant 0 : i32
    return %arg0, %c0_i32 : i32, i32
  }
  func.func @transform_1(%arg0: i32) -> (i32, i32) {
    %c0_i32 = arith.constant 0 : i32
    %c0_i32_0 = arith.constant 0 : i32
    %c0_i32_1 = arith.constant 0 : i32
    return %c0_i32, %c0_i32_0 : i32, i32
  }
  func.func @transform_2(%arg0: i32) -> (i32, i32) {
    %c0_i32 = arith.constant 0 : i32
    %c0_i32_0 = arith.constant 0 : i32
    %c0_i32_1 = arith.constant 0 : i32
    return %c0_i32, %c0_i32_0 : i32, i32
  }
  func.func @transform_3(%arg0: i32) -> (i32, i32) {
    %c0_i32 = arith.constant 0 : i32
    %c0_i32_0 = arith.constant 0 : i32
    %c0_i32_1 = arith.constant 0 : i32
    return %c0_i32, %c0_i32_0 : i32, i32
  }
  func.func @transform_4(%arg0: i32) -> (i32, i32) {
    %c0_i32 = arith.constant 0 : i32
    %c0_i32_0 = arith.constant 0 : i32
    %c0_i32_1 = arith.constant 0 : i32
    return %c0_i32, %c0_i32_0 : i32, i32
  }
  func.func @transform_5(%arg0: i32) -> (i32, i32) {
    %c0_i32 = arith.constant 0 : i32
    %c0_i32_0 = arith.constant 0 : i32
    %c0_i32_1 = arith.constant 0 : i32
    return %c0_i32, %c0_i32_0 : i32, i32
  }
  func.func @transform_6(%arg0: i32) -> (i32, i32) {
    %c0_i32 = arith.constant 0 : i32
    %c0_i32_0 = arith.constant 0 : i32
    %c0_i32_1 = arith.constant 0 : i32
    return %c0_i32, %c0_i32_0 : i32, i32
  }
  func.func @transform_7(%arg0: i32) -> (i32, i32) {
    %c0_i32 = arith.constant 0 : i32
    %c0_i32_0 = arith.constant 0 : i32
    return %arg0, %c0_i32 : i32, i32
  }
}

</mosaic_0001>

<bundles_post_ra>
// kernel: tpu_custom_call.1
= control target key start
LH: loop header
LB: loop body
LE: loop exit
PB: predicated region body
PF: predicated region fallthrough
CT: control target
= control target key end

     0   :  { %v326_v0 = vmov 0.0   ;;  %vm53_vm0 = vcmask 1041408   ;;  %vm327_vm1 = vmmov 0   ;;  %vm49_vm2 = vcmask 162816   ;;  %s416_s1 = inlined_call_operand.vmem [shape: bf16[20,64], index: 1, kind: input, shape index: {}]   ;;  %s417_s0 = inlined_call_operand.vmem [shape: f32[16,20], index: 0, kind: input, shape index: {}]   ;;  %s418_s3 = inlined_call_operand.vmem [shape: bf16[64,32], index: 3, kind: input, shape index: {}]   ;;  %s419_s2 = inlined_call_operand.vmem [shape: f32[1,64], index: 2, kind: input, shape index: {}]   ;;  %s420_s5 = inlined_call_operand.vmem [shape: bf16[32,3], index: 5, kind: input, shape index: {}]   ;;  %s421_s4 = inlined_call_operand.vmem [shape: f32[1,32], index: 4, kind: input, shape index: {}]   ;;  %s422_s6 = inlined_call_operand.vmem [shape: f32[1,3], index: 6, kind: input, shape index: {}]   ;;  %s423_s7 = inlined_call_operand.vmem [shape: f32[16,3], index: 7, kind: output, shape index: {}]  }
   0x1   :  { %288 = vmatprep.subr.bf16.mxu0 %v326_v0  ;;  %v318_v1 = vld [vmem:[%s416_s1] sm:$0xff]   ;;  %292 = vmatprep.mubr.msk.bf16.mxu0 %vm327_vm1, %v326_v0  ;;  %v319_v2 = vld [vmem:[%s416_s1 + $0x8] ss:$0 sps:$4 sm:$0x33]   ;;  %v322_v9 = vld [vmem:[%s418_s3 + $0x10] sm:$0xff]   ;;  %vm140_vm3 = vcmask 523264  }
   0x2   :  { %v27_v3 = vld [vmem:[%s417_s0] sm:$0xff]  ;;  %296 = vmatprep.subr.bf16.mxu1 %v326_v0  ;;  %304 = vmatprep.mubr.msk.bf16.mxu1 %vm327_vm1, %v326_v0  ;;  %v28_v4 = vld [vmem:[%s417_s0 + $0x8] sm:$0xff]  ;;  %v55_v5 = vsel %vm53_vm0, %v319_v2, 0  ;;  %v323_v10 = vld [vmem:[%s418_s3 + $0x18] sm:$0xff]   ;;  %vm211_vm4 = vcmask 261120   ;;  %vm256_vm5 = vcmask 23552  }
   0x3   :  { %289 = vmatpush3.bf16.msra.mxu0 %v318_v1  ;;  %v320_v6 = vld [vmem:[%s418_s3] sm:$0xff]   ;;  %v321_v7 = vld [vmem:[%s418_s3 + $0x8] sm:$0xff]   ;;  %v29_v8 = vpack.c.bf16 %v28_v4, %v27_v3 }
   0x4   :  { %290 = vmatprep.subr.bf16.mxu0 %v326_v0  ;;  %297 = vmatpush3.bf16.msra.mxu1 %v320_v6  ;;  %v263_v11 = vld [vmem:[%s419_s2] ss:$0 sm:$0xff]  ;;  %v325_v22 = vld [vmem:[%s420_s5 + $0x8] sm:$0xff]  }
   0x5   :  { %298 = vmatprep.subr.bf16.mxu1 %v326_v0  ;;  %v324_v21 = vld [vmem:[%s420_s5] sm:$0xff]  }
   0x6   :  { %v267_v23 = vld [vmem:[%s421_s4] ss:$0 sm:$0xff] }
   0x7   :  { %291 = vmatpush3.bf16.msra.mxu0 %v55_v5  ;;  %v273_v33 = vld [vmem:[%s422_s6] ss:$0 sm:$0xff] }
   0x8   :  { %308 = vmatprep.subr.bf16.mxu0 %v326_v0  ;;  %299 = vmatpush3.bf16.msra.mxu1 %v321_v7 }
   0x9   :  { %300 = vmatprep.subr.bf16.mxu1 %v326_v0 }
   0xa   :  { %293 = vmatmul.mubr.msk.bf16.vlgmr.msra.gmra.mrb[0].mxu0 %vm49_vm2, %v29_v8 }
   0xb   :  { %312 = vmatprep.mubr.msk.bf16.mxu0 %vm327_vm1, %v326_v0  ;;  %309 = vmatpush3.bf16.msra.mxu0 %v324_v21 }
   0xc   :  { %301 = vmatpush3.bf16.msra.mxu1 %v322_v9  ;;  %310 = vmatprep.subr.bf16.mxu0 %v326_v0 }
   0xd   :  { %302 = vmatprep.subr.bf16.mxu1 %v326_v0 }
   0xf   :  { %311 = vmatpush3.bf16.msra.mxu0 %v325_v22 }
  0x10   :  { %303 = vmatpush3.bf16.msra.mxu1 %v323_v10 }
  0xdd   :  { %v91_v12 = vpop.f32.mrb[0].mxu0 }
  0xde   :  { %v92_v13 = vadd.f32 %v263_v11, %v91_v12  ;;  %v294_v14 = vpop.f32.mrb[1].mxu0 }
  0xdf   :  { %v94_v15 = vpop.f32.mrb[2].mxu0 }
  0xe0   :  { %v95_v16 = vadd.f32 %v263_v11, %v94_v15  ;;  %v295_v17 = vpop.f32.mrb[3].mxu0  ;;  %v98_v18 = vmax.f32 %v92_v13, 0.0 }
  0xe2   :  { %v99_v19 = vmax.f32 %v95_v16, 0.0 }
  0xe4   :  { %v100_v20 = vpack.c.bf16 %v99_v19, %v98_v18 }
  0xe6   :  { %305 = vmatmul.mubr.msk.bf16.vlgmr.msra.gmra.mrb[0].mxu1 %vm140_vm3, %v100_v20 }
 0x1b9   :  { %v178_v24 = vpop.f32.mrb[0].mxu1 }
 0x1ba   :  { %v179_v25 = vadd.f32 %v267_v23, %v178_v24  ;;  %v306_v26 = vpop.f32.mrb[1].mxu1 }
 0x1bb   :  { %v181_v27 = vpop.f32.mrb[2].mxu1 }
 0x1bc   :  { %v182_v28 = vadd.f32 %v267_v23, %v181_v27  ;;  %v307_v29 = vpop.f32.mrb[3].mxu1  ;;  %v185_v30 = vmax.f32 %v179_v25, 0.0 }
 0x1be   :  { %v186_v31 = vmax.f32 %v182_v28, 0.0 }
 0x1c0   :  { %v187_v32 = vpack.c.bf16 %v186_v31, %v185_v30 }
 0x1c2   :  { %313 = vmatmul.mubr.msk.bf16.vlgmr.msra.gmra.mrb[4].mxu0 %vm211_vm4, %v187_v32 }
 0x295   :  { %v249_v34 = vpop.f32.mrb[4].mxu0 }
 0x296   :  { %v250_v35 = vadd.f32 %v273_v33, %v249_v34  ;;  %v314_v36 = vpop.f32.mrb[5].mxu0 }
 0x297   :  { %v252_v37 = vpop.f32.mrb[6].mxu0 }
 0x298   :  { %257 = vst.msk [vmem:[%s423_s7] sm:$0xff] %vm256_vm5, %v250_v35  ;;  %v253_v38 = vadd.f32 %v273_v33, %v252_v37  ;;  %v315_v39 = vpop.f32.mrb[7].mxu0 }
 0x29a   :  { %258 = vst.msk [vmem:[%s423_s7 + $0x8] sm:$0xff] %vm256_vm5, %v253_v38 }

</bundles_post_ra>
